<compile_context>
chip_gen: v5e
topology: v5e:2x2
jax: 0.10.0
libtpu: 0.0.40
codegen_flags: <defaults>
</compile_context>

<pallas_src>
import jax
import jax.numpy as jnp
import numpy as np
from jax import lax
from jax.experimental import pallas as pl
from jax.experimental.pallas import tpu as pltpu

LN_EPS = 1e-5  # torch.nn.LayerNorm default


def _layernorm(x, gamma, beta):
    mu = jnp.mean(x, axis=-1, keepdims=True)
    var = jnp.mean((x - mu) ** 2, axis=-1, keepdims=True)
    return (x - mu) * lax.rsqrt(var + LN_EPS) * gamma + beta


def importance_kernel(o_ref, w_ref, pre_ref, out_ref):
    o = o_ref[0]                                            # (M, d): tb batches folded into M
    # Single MXU matmul: logits = O @ fused_w^T   (fused_w = ecol @ (Wb + I), zero-padded rows)
    logits = lax.dot_general(o, w_ref[...], (((1,), (1,)), ((), ())),
                             preferred_element_type=jnp.float32)      # (M, C_pad)
    # + pre @ ecol^T (broadcast over the tb folded batches; padded columns = -1e30)
    logits = logits + pre_ref[...]
    # numerically-stable softmax over the padded column axis (padded cols -> exactly 0)
    m = jnp.max(logits, axis=-1, keepdims=True)
    e = jnp.exp(logits - m)
    # exact reciprocal keeps the 1e-5 tolerance (approx=True would use the idle EUP slot).
    out_ref[0] = e * pl.reciprocal(jnp.sum(e, axis=-1, keepdims=True))


def _pick_tb(B, P, d, c_pad, budget_bytes=16 * 1024 * 1024):
    """Pick TB (batches folded per grid step) against a total per-step VMEM budget."""
    def vmem_bytes(tb):
        M = tb * P
        return 4 * (2 * M * d          # O block, double-buffered
                    + 2 * M * c_pad    # output block, double-buffered
                    + 1 * M * c_pad    # pre-logits constant (single-buffered)
                    + 1 * c_pad * d    # fused weight constant (single-buffered)
                    + 3 * M * c_pad)   # headroom for in-kernel temporaries (logits, exp)

    divs = [t for t in range(1, B + 1) if B % t == 0]
    feas = [t for t in divs if vmem_bytes(t) <= budget_bytes]
    if not feas:
        # A single batch already exceeds the budget; nothing left to split along B.
        return 1

    def pick(cands):
        capped = [t for t in cands if t * P <= 1024]   # 512-1024 rows ~ HBM-roofline sweet spot
        return max(capped) if capped else min(cands)

    g2 = [t for t in feas if B // t >= 2]              # keep >= 2 grid steps for v7x's 2 TCs
    tb = pick(g2) if g2 else pick(feas)
    if tb * P < 128:                                   # don't starve the block just for G >= 2
        alt = pick(feas)
        if alt * P > tb * P:
            tb = alt
    return tb


def importance_getter(O, pemb, colemb, W, bias, g1, b1, g2, b2):
    """O: (B, P, d) f32.  Returns (B, P, C) f32 softmax attention weights."""
    B, P, d = O.shape
    C = colemb.shape[0]
    c_pad = ((C + 127) // 128) * 128                   # lane-dense output width

    tb = _pick_tb(B, P, d, c_pad)
    G = B // tb
    M = tb * P

    # ---- batch-invariant precompute (tiny, one-time, pure JAX) -------------
    # PyTorch: dense(x) = x @ W.T + b, W of shape (d, 2d) => split Wa = W[:, :d], Wb = W[:, d:].
    a = _layernorm(pemb, g1, b1)                                   # (P, d)
    pre = jnp.einsum('pi,oi->po', a, W[:, :d]) + bias + pemb       # (P, d)
    ecol = _layernorm(colemb, g2, b2)                              # (C, d)
    wb = W[:, d:]                                                  # (d, d)
    # (O @ Wb^T + O) @ ecol^T == O @ (ecol @ (Wb + I))^T
    fused_w = ecol @ (wb + jnp.eye(d, dtype=W.dtype))              # (C, d)
    pre_logits = pre @ ecol.T                                      # (P, C)

    # Pad the column dim: zero fused-weight rows and -1e30 pre-logits make the
    # padded softmax columns exactly 0 (sliced off below).
    fused_w = jnp.pad(fused_w, ((0, c_pad - C), (0, 0)))           # (c_pad, d)
    pre_logits = jnp.pad(pre_logits, ((0, 0), (0, c_pad - C)),
                         constant_values=-1e30)                    # (P, c_pad)
    pre_tiled = jnp.tile(pre_logits, (tb, 1))                      # (M, c_pad) -- small

    O3 = O.reshape(G, M, d)      # fold tb batches into the matmul M dim (free reshape)

    grid_spec = pltpu.PrefetchScalarGridSpec(
        num_scalar_prefetch=0,
        grid=(G,),
        in_specs=[
            pl.BlockSpec((1, M, d), lambda g: (g, 0, 0)),              # O (streamed per step)
            pl.BlockSpec((c_pad, d), lambda g: (0, 0),
                         pipeline_mode=pl.Buffered(1)),                # fused weight (resident)
            pl.BlockSpec((M, c_pad), lambda g: (0, 0),
                         pipeline_mode=pl.Buffered(1)),                # pre-logits (resident)
        ],
        out_specs=pl.BlockSpec((1, M, c_pad), lambda g: (g, 0, 0)),    # lane-dense output
    )

    out = pl.pallas_call(
        importance_kernel,
        out_shape=jax.ShapeDtypeStruct((G, M, c_pad), jnp.float32),
        grid_spec=grid_spec,
        compiler_params=pltpu.CompilerParams(
            dimension_semantics=("parallel",),        # batch axis: shard across TCs on v7x
            vmem_limit_bytes=32 * 1024 * 1024),
    )(O3, fused_w, pre_tiled)

    out = out.reshape(B, P, c_pad)
    return out[..., :C] if c_pad != C else out


def importance_getter_ref(O, pemb, colemb, W, bias, g1, b1, g2, b2):
    """Pure-JAX reference mirroring the PyTorch forward."""
    B = O.shape[0]
    eprompt = jnp.broadcast_to(pemb[None], (B,) + pemb.shape)
    a = _layernorm(eprompt, g1, b1)
    dense_in = jnp.concatenate((a, O), axis=-1)
    dense_out = jnp.einsum('bpi,oi->bpo', dense_in, W) + bias
    dense_out = dense_out + eprompt + O
    ecol = _layernorm(jnp.broadcast_to(colemb[None], (B,) + colemb.shape), g2, b2)
    logits = jnp.einsum('bpd,bcd->bpc', dense_out, ecol)
    return jax.nn.softmax(logits, axis=-1)


if __name__ == "__main__":
    # Small but non-trivial shapes: enough batch to exercise the grid tiling
    # (tb=16 -> 128 MXU rows per step, grid=(2,) so both v7x TCs get a step).
    B, P, C, d = 32, 8, 4, 32

    key = jax.random.PRNGKey(0)
    k_o, k_pe, k_ce, k_w, k_b = jax.random.split(key, 5)

    O = jax.random.normal(k_o, (B, P, d), dtype=jnp.float32)

    # Parameter init (deterministic, matching the module's shapes):
    pemb = 0.01 * jax.random.normal(k_pe, (P, d), dtype=jnp.float32)
    colemb = 0.01 * jax.random.normal(k_ce, (C, d), dtype=jnp.float32)
    lim = 1.0 / np.sqrt(2 * d)                        # nn.Linear default range
    W = jax.random.uniform(k_w, (d, 2 * d), jnp.float32, -lim, lim)
    bias = jax.random.uniform(k_b, (d,), jnp.float32, -lim, lim)
    g1 = jnp.ones((d,), jnp.float32)
    b1 = jnp.zeros((d,), jnp.float32)
    g2 = jnp.ones((d,), jnp.float32)
    b2 = jnp.zeros((d,), jnp.float32)

    out = importance_getter(O, pemb, colemb, W, bias, g1, b1, g2, b2)
    out = jax.block_until_ready(out)

    ref = importance_getter_ref(O, pemb, colemb, W, bias, g1, b1, g2, b2)
    np.testing.assert_allclose(np.asarray(out), np.asarray(ref),
                               rtol=1e-5, atol=1e-5)

    print("KERNEL_OK")
</pallas_src>

<mosaic_0001>
module attributes {stable_mosaic.version = 11 : i64} {
  func.func @importance_kernel(%arg0: i32, %arg1: memref<1x128x32xf32, #tpu.memory_space<vmem>>, %arg2: memref<128x32xf32, #tpu.memory_space<vmem>>, %arg3: memref<128x128xf32, #tpu.memory_space<vmem>>, %arg4: memref<1x128x128xf32, #tpu.memory_space<vmem>>) attributes {dimension_semantics = [#tpu.dimension_semantics<parallel>], iteration_bounds = array<i64: 2>, scalar_prefetch = 0 : i64, scratch_operands = 0 : i64, tpu.core_type = #tpu.core_type<tc>, window_params = [{transform_indices = @transform_0, window_bounds = array<i64: 1, 128, 32>}, {pipeline_mode = #tpu.pipeline_mode<synchronous>, transform_indices = @transform_1, window_bounds = array<i64: 128, 32>}, {pipeline_mode = #tpu.pipeline_mode<synchronous>, transform_indices = @transform_2, window_bounds = array<i64: 128, 128>}, {transform_indices = @transform_3, window_bounds = array<i64: 1, 128, 128>}]} {
    %c0 = arith.constant 0 : index
    %c0_0 = arith.constant 0 : index
    %c0_1 = arith.constant 0 : index
    %0 = vector.load %arg1[%c0, %c0_0, %c0_1] : memref<1x128x32xf32, #tpu.memory_space<vmem>>, vector<1x128x32xf32>
    %1 = vector.shape_cast %0 : vector<1x128x32xf32> to vector<128x32xf32>
    %c0_2 = arith.constant 0 : index
    %c0_3 = arith.constant 0 : index
    %2 = vector.load %arg2[%c0_2, %c0_3] : memref<128x32xf32, #tpu.memory_space<vmem>>, vector<128x32xf32>
    %cst = arith.constant dense<0.000000e+00> : vector<128x128xf32>
    %3 = tpu.matmul %1, %2, %cst {dimension_numbers = #tpu.dot_dimension_numbers<[1], [1], [0], [0], [0, 0, 1, 0], [], []>} : vector<128x32xf32>, vector<128x32xf32>, vector<128x128xf32> -> vector<128x128xf32>
    %c0_4 = arith.constant 0 : index
    %c0_5 = arith.constant 0 : index
    %4 = vector.load %arg3[%c0_4, %c0_5] : memref<128x128xf32, #tpu.memory_space<vmem>>, vector<128x128xf32>
    %5 = arith.addf %3, %4 : vector<128x128xf32>
    %cst_6 = arith.constant dense<0xFF800000> : vector<128xf32>
    %6 = vector.multi_reduction <maximumf>, %5, %cst_6 [1] : vector<128x128xf32> to vector<128xf32>
    %7 = vector.shape_cast %6 : vector<128xf32> to vector<128x1xf32>
    %8 = vector.broadcast %7 : vector<128x1xf32> to vector<128x128xf32>
    %9 = arith.subf %5, %8 : vector<128x128xf32>
    %10 = math.exp %9 : vector<128x128xf32>
    %cst_7 = arith.constant dense<0.000000e+00> : vector<128xf32>
    %11 = vector.multi_reduction <add>, %10, %cst_7 [1] : vector<128x128xf32> to vector<128xf32>
    %12 = vector.shape_cast %11 : vector<128xf32> to vector<128x1xf32>
    %13 = tpu.reciprocal %12 : vector<128x1xf32> -> vector<128x1xf32>
    %14 = vector.broadcast %13 : vector<128x1xf32> to vector<128x128xf32>
    %15 = arith.mulf %10, %14 : vector<128x128xf32>
    %c0_8 = arith.constant 0 : index
    %c0_9 = arith.constant 0 : index
    %c0_10 = arith.constant 0 : index
    %16 = vector.load %arg4[%c0_8, %c0_9, %c0_10] : memref<1x128x128xf32, #tpu.memory_space<vmem>>, vector<1x128x128xf32>
    %17 = vector.shape_cast %16 : vector<1x128x128xf32> to vector<128x128xf32>
    %18 = vector.shape_cast %15 : vector<128x128xf32> to vector<1x128x128xf32>
    tpu.vector_store %arg4[%c0_8, %c0_9, %c0_10], %18 {strides = array<i32>} : memref<1x128x128xf32, #tpu.memory_space<vmem>>, vector<1x128x128xf32>,
    return
  }
  func.func @transform_0(%arg0: i32) -> (i32, i32, i32) {
    %c0_i32 = arith.constant 0 : i32
    %c0_i32_0 = arith.constant 0 : i32
    %c0_i32_1 = arith.constant 0 : i32
    return %arg0, %c0_i32, %c0_i32_0 : i32, i32, i32
  }
  func.func @transform_1(%arg0: i32) -> (i32, i32) {
    %c0_i32 = arith.constant 0 : i32
    %c0_i32_0 = arith.constant 0 : i32
    %c0_i32_1 = arith.constant 0 : i32
    return %c0_i32, %c0_i32_0 : i32, i32
  }
  func.func @transform_2(%arg0: i32) -> (i32, i32) {
    %c0_i32 = arith.constant 0 : i32
    %c0_i32_0 = arith.constant 0 : i32
    %c0_i32_1 = arith.constant 0 : i32
    return %c0_i32, %c0_i32_0 : i32, i32
  }
  func.func @transform_3(%arg0: i32) -> (i32, i32, i32) {
    %c0_i32 = arith.constant 0 : i32
    %c0_i32_0 = arith.constant 0 : i32
    %c0_i32_1 = arith.constant 0 : i32
    return %arg0, %c0_i32, %c0_i32_0 : i32, i32, i32
  }
}

</mosaic_0001>

<bundles_post_ra>
// kernel: tpu_custom_call.1
= control target key start
LH: loop header
LB: loop body
LE: loop exit
PB: predicated region body
PF: predicated region fallthrough
CT: control target
= control target key end

     0   :  { %8 = vsyncpa [#allocation3], 0  ;;  %s1677_s0 = inlined_call_operand.vmem [shape: f32[2,128,32], index: 0, kind: input, shape index: {}]   ;;  %s1678_s1 = inlined_call_operand.vmem [shape: f32[128,32], index: 1, kind: input, shape index: {}]   ;;  %s1679_s2 = inlined_call_operand.vmem [shape: f32[128,128], index: 2, kind: input, shape index: {}]   ;;  %s1680_s3 = inlined_call_operand.hbm [shape: f32[2,128,128], index: 3, kind: output, shape index: {}]  }
   0x1   :  { %10 = vsyncpa [#allocation3 + $0x1], 0  ;;  %s1110_s12 = smov 0   ;;  %s1112_s13 = smov 0  }
   0x2   :  { %s1114_s14 = smov 0   ;;  %s1116_s15 = smov 0  }
   0x3 LB: > { %s1131_s16 = sadd.s32 4294967295, %s1086_s15   ;;  %s825_s17 = sadd.s32 4294967294, %s1086_s15   ;;  %s1086_s15 = sphi %s1116_s15, %s1696_s15   ;;  %s1082_s14 = sphi %s1114_s14, %s1695_s14   ;;  %s1078_s13 = sphi %s1112_s13, %s1694_s13   ;;  %s1074_s12 = sphi %s1110_s12, %s1693_s12  }
   0x4   : > { %s1135_s18 = sadd.s32 1, %s1086_s15   ;;  %s91_s19 = sadd.s32 1, %s1082_s14 }
   0x5   : > { %s88_s20 = ssub.s32 %s1086_s15, %s1135_s18  ;;  %p101_p0 = scmp.ne.s32.totalorder %s1082_s14, %s1078_s13 }
   0x6   : > { %p89_p1 = scmp.eq.s32.totalorder %s88_s20, 0  ;;  %p102_p2 = scmp.eq.s32.totalorder %s1131_s16, 1 }
   0x7   : > { %p107_p3 = scmp.ne.s32.totalorder %s1078_s13, %s1074_s12  ;;  %p108_p4 = scmp.eq.s32.totalorder %s825_s17, 1 }
   0x8   : > { %s1146_s21 = scalar_select %p89_p1, %s1082_s14, %s91_s19  }
   0x9   : > { %p1148_p5 = por %p102_p2, %p101_p0  ;;  %p1152_p6 = por %p108_p4, %p107_p3 }
   0xa   : > { %p828_p7 = scmp.ge.s32.totalorder %s1086_s15, 1  ;;  %p140_p8 = scmp.lt.s32.totalorder %s1086_s15, 3 }
   0xc   : > { %p141_p9 = pnand %p828_p7, %p140_p8 }
   0xd   : > { %p164_p10 = scmp.lt.s32.totalorder (!%p141_p9), %s1131_s16, 1  ;;  %s161_s17 = sand.u32 (!%p141_p9), 1, %s1078_s13  }
   0xe   : > { %144 = sbr.rel (%p141_p9) target bundleno = 528 (0x210), region = 32  ;;  %s829_s19 = sshll.u32 (!%p141_p9), %s161_s17, 7 }
   0xf   : > { %s1489_s20 = scalar_lea.vmem (!%p141_p9), [#allocation2], %s829_s19  ;;  %s748_s29 = scalar_lea.sflag (!%p141_p9), [#allocation3], %s161_s17 }
  0x10   : > { %s760_s27 = sshll.u32 (!%p141_p9), %s1489_s20, 4  ;;  %s761_s27 = int_to_ptr.vmem [resolvable:$true] %s760_s27 }
  0x13   : > { %v200_v0 = vld [vmem:[%s1678_s1 + $0x78] sm:$0xff]  ;;  %vm217_vm0 = vcmask 261120   ;;  %v199_v1 = vld [vmem:[%s1678_s1 + $0x70] sm:$0xff]  ;;  %v198_v2 = vld [vmem:[%s1678_s1 + $0x68] sm:$0xff]  ;;  %s165_s7 = scalar_select %p164_p10, %s1131_s16, 1 }
  0x14   : > { %832 = vmatpush.xpose.msk.msra.mxu0 %vm217_vm0, %v200_v0  ;;  %871 = vmatpush.xpose.msk.msra.mxu1 %vm217_vm0, %v200_v0  ;;  %v197_v3 = vld [vmem:[%s1678_s1 + $0x60] sm:$0xff]  ;;  %v196_v4 = vld [vmem:[%s1678_s1 + $0x58] sm:$0xff]  ;;  %v195_v5 = vld [vmem:[%s1678_s1 + $0x50] sm:$0xff] }
  0x15   : > { %872 = vmatpush.xpose.msk.msra.mxu2 %vm217_vm0, %v200_v0  ;;  %873 = vmatpush.xpose.msk.msra.mxu3 %vm217_vm0, %v200_v0  ;;  %v194_v6 = vld [vmem:[%s1678_s1 + $0x48] sm:$0xff]  ;;  %v193_v7 = vld [vmem:[%s1678_s1 + $0x40] sm:$0xff]  ;;  %v192_v8 = vld [vmem:[%s1678_s1 + $0x38] sm:$0xff]  ;;  %s869_s10 = sshll.u32 %s165_s7, 7  ;;  %s1044_s7 = scalar_lea.hbm %s1680_s3, 256 }
  0x16   : > { %v191_v9 = vld [vmem:[%s1678_s1 + $0x30] sm:$0xff]  ;;  %v190_v10 = vld [vmem:[%s1678_s1 + $0x28] sm:$0xff]  ;;  %v189_v11 = vld [vmem:[%s1678_s1 + $0x20] sm:$0xff]  ;;  %s1271_s24 = scalar_lea.vmem %s1677_s0, %s869_s10 }
  0x17   : > { %v188_v12 = vld [vmem:[%s1678_s1 + $0x18] sm:$0xff]  ;;  %v187_v13 = vld [vmem:[%s1678_s1 + $0x10] sm:$0xff]  ;;  %v186_v14 = vld [vmem:[%s1678_s1 + $0x8] sm:$0xff] }
  0x18   : > { %833 = vmatpush.xpose.msk.msra.mxu0 %vm217_vm0, %v199_v1  ;;  %874 = vmatpush.xpose.msk.msra.mxu1 %vm217_vm0, %v199_v1  ;;  %v185_v15 = vld [vmem:[%s1678_s1] sm:$0xff]  ;;  %v170_v20 = vld [vmem:[%s1271_s24 + $0x8] sm:$0xff]  ;;  %v171_v24 = vld [vmem:[%s1271_s24 + $0x10] sm:$0xff] }
  0x19   : > { %875 = vmatpush.xpose.msk.msra.mxu2 %vm217_vm0, %v199_v1  ;;  %876 = vmatpush.xpose.msk.msra.mxu3 %vm217_vm0, %v199_v1  ;;  %v169_v16 = vld [vmem:[%s1271_s24] sm:$0xff]  ;;  %v174_v21 = vld [vmem:[%s1271_s24 + $0x28] sm:$0xff]  ;;  %v175_v25 = vld [vmem:[%s1271_s24 + $0x30] sm:$0xff] }
  0x1a   : > { %v173_v17 = vld [vmem:[%s1271_s24 + $0x20] sm:$0xff]  ;;  %v178_v22 = vld [vmem:[%s1271_s24 + $0x48] sm:$0xff]  ;;  %v179_v26 = vld [vmem:[%s1271_s24 + $0x50] sm:$0xff] }
  0x1b   : > { %v177_v18 = vld [vmem:[%s1271_s24 + $0x40] sm:$0xff]  ;;  %v182_v23 = vld [vmem:[%s1271_s24 + $0x68] sm:$0xff]  ;;  %v183_v27 = vld [vmem:[%s1271_s24 + $0x70] sm:$0xff] }
  0x1c   : > { %834 = vmatpush.xpose.msk.msra.mxu0 %vm217_vm0, %v198_v2  ;;  %877 = vmatpush.xpose.msk.msra.mxu1 %vm217_vm0, %v198_v2  ;;  %v181_v19 = vld [vmem:[%s1271_s24 + $0x60] sm:$0xff]  ;;  %v172_v28 = vld [vmem:[%s1271_s24 + $0x18] sm:$0xff]  ;;  %v206_v45 = vld [vmem:[%s1679_s2 + $0x28] sm:$0xff] }
  0x1d   : > { %878 = vmatpush.xpose.msk.msra.mxu2 %vm217_vm0, %v198_v2  ;;  %879 = vmatpush.xpose.msk.msra.mxu3 %vm217_vm0, %v198_v2  ;;  %v176_v29 = vld [vmem:[%s1271_s24 + $0x38] sm:$0xff]  ;;  %v201_v32 = vld [vmem:[%s1679_s2] sm:$0xff]  ;;  %v203_v47 = vld [vmem:[%s1679_s2 + $0x10] sm:$0xff] }
  0x1e   : > { %v180_v30 = vld [vmem:[%s1271_s24 + $0x58] sm:$0xff]  ;;  %v205_v33 = vld [vmem:[%s1679_s2 + $0x20] sm:$0xff]  ;;  %v202_v48 = vld [vmem:[%s1679_s2 + $0x8] sm:$0xff] }
  0x1f   : > { %v184_v31 = vld [vmem:[%s1271_s24 + $0x78] sm:$0xff]  ;;  %v209_v38 = vld [vmem:[%s1679_s2 + $0x40] sm:$0xff]  ;;  %v211_v55 = vld [vmem:[%s1679_s2 + $0x50] sm:$0xff]  ;;  %s870_s24 = sshll.u32 %s1131_s16, 7 }
  0x20   : > { %835 = vmatpush.xpose.msk.msra.mxu0 %vm217_vm0, %v197_v3  ;;  %880 = vmatpush.xpose.msk.msra.mxu1 %vm217_vm0, %v197_v3  ;;  %v213_v39 = vld [vmem:[%s1679_s2 + $0x60] sm:$0xff]  ;;  %v210_v56 = vld [vmem:[%s1679_s2 + $0x48] sm:$0xff]  ;;  %v204_v62 = vld [vmem:[%s1679_s2 + $0x18] sm:$0xff]  ;;  %s759_s26 = scalar_lea.hbm %s1680_s3, %s870_s24 }
  0x21   : > { %881 = vmatpush.xpose.msk.msra.mxu2 %vm217_vm0, %v197_v3  ;;  %882 = vmatpush.xpose.msk.msra.mxu3 %vm217_vm0, %v197_v3  ;;  %v212_v0 = vld [vmem:[%s1679_s2 + $0x58] sm:$0xff]  ;;  %v207_v1 = vld [vmem:[%s1679_s2 + $0x30] sm:$0xff]  ;;  %s762_s28 = sshll.u32 %s759_s26, 4  ;;  %s763_s28 = int_to_ptr.hbm [resolvable:$true] %s762_s28 }
  0x22   : > { %s1038_s30 = sshra.s32 %s763_s28, 4  ;;  %s1039_s30 = int_to_ptr.hbm [resolvable:$true] %s1038_s30 }
  0x23   : > { %s1040_s4 = scalar_lea.hbm %s1039_s30, 128  ;;  %p1045_p0 = scmp.lt.s32.totalorder %s1039_s30, %s1680_s3 }
  0x24   : > { %836 = vmatpush.xpose.msk.msra.mxu0 %vm217_vm0, %v196_v4  ;;  %883 = vmatpush.xpose.msk.msra.mxu1 %vm217_vm0, %v196_v4  ;;  %p1041_p11 = scmp.ne.s32.totalorder %s1039_s30, %s1040_s4  ;;  %p1046_p1 = scmp.lt.s32.totalorder %s1044_s7, %s1040_s4 }
  0x25   : > { %884 = vmatpush.xpose.msk.msra.mxu2 %vm217_vm0, %v196_v4  ;;  %885 = vmatpush.xpose.msk.msra.mxu3 %vm217_vm0, %v196_v4 }
  0x26   : > { %p1042_p12 = pnand %p1041_p11, %p1148_p5  ;;  %p1047_p2 = por %p1046_p1, %p1045_p0 }
  0x28   : > { %837 = vmatpush.xpose.msk.msra.mxu0 %vm217_vm0, %v195_v5  ;;  %886 = vmatpush.xpose.msk.msra.mxu1 %vm217_vm0, %v195_v5  ;;  %p1043_p13 = pneg %p1042_p12 }
  0x29   : > { %887 = vmatpush.xpose.msk.msra.mxu2 %vm217_vm0, %v195_v5  ;;  %888 = vmatpush.xpose.msk.msra.mxu3 %vm217_vm0, %v195_v5 }
  0x2a   : > { %p1048_p3 = pnand %p1047_p2, %p1043_p13 }
  0x2c   : > { %838 = vmatpush.xpose.msk.msra.mxu0 %vm217_vm0, %v194_v6  ;;  %889 = vmatpush.xpose.msk.msra.mxu1 %vm217_vm0, %v194_v6 }
  0x2d   : > { %890 = vmatpush.xpose.msk.msra.mxu2 %vm217_vm0, %v194_v6  ;;  %891 = vmatpush.xpose.msk.msra.mxu3 %vm217_vm0, %v194_v6  ;;  %v215_v6 = vld [vmem:[%s1679_s2 + $0x70] sm:$0xff] }
  0x30   : > { %839 = vmatpush.xpose.msk.msra.mxu0 %vm217_vm0, %v193_v7  ;;  %892 = vmatpush.xpose.msk.msra.mxu1 %vm217_vm0, %v193_v7 }
  0x31   : > { %893 = vmatpush.xpose.msk.msra.mxu2 %vm217_vm0, %v193_v7  ;;  %894 = vmatpush.xpose.msk.msra.mxu3 %vm217_vm0, %v193_v7  ;;  %v208_v7 = vld [vmem:[%s1679_s2 + $0x38] sm:$0xff] }
  0x34   : > { %840 = vmatpush.xpose.msk.msra.mxu0 %vm217_vm0, %v192_v8  ;;  %895 = vmatpush.xpose.msk.msra.mxu1 %vm217_vm0, %v192_v8 }
  0x35   : > { %896 = vmatpush.xpose.msk.msra.mxu2 %vm217_vm0, %v192_v8  ;;  %897 = vmatpush.xpose.msk.msra.mxu3 %vm217_vm0, %v192_v8 }
  0x38   : > { %841 = vmatpush.xpose.msk.msra.mxu0 %vm217_vm0, %v191_v9  ;;  %898 = vmatpush.xpose.msk.msra.mxu1 %vm217_vm0, %v191_v9 }
  0x39   : > { %899 = vmatpush.xpose.msk.msra.mxu2 %vm217_vm0, %v191_v9  ;;  %900 = vmatpush.xpose.msk.msra.mxu3 %vm217_vm0, %v191_v9  ;;  %v216_v9 = vld [vmem:[%s1679_s2 + $0x78] sm:$0xff] }
  0x3c   : > { %842 = vmatpush.xpose.msk.msra.mxu0 %vm217_vm0, %v190_v10  ;;  %901 = vmatpush.xpose.msk.msra.mxu1 %vm217_vm0, %v190_v10 }
  0x3d   : > { %902 = vmatpush.xpose.msk.msra.mxu2 %vm217_vm0, %v190_v10  ;;  %903 = vmatpush.xpose.msk.msra.mxu3 %vm217_vm0, %v190_v10 }
  0x40   : > { %843 = vmatpush.xpose.msk.msra.mxu0 %vm217_vm0, %v189_v11  ;;  %904 = vmatpush.xpose.msk.msra.mxu1 %vm217_vm0, %v189_v11 }
  0x41   : > { %905 = vmatpush.xpose.msk.msra.mxu2 %vm217_vm0, %v189_v11  ;;  %906 = vmatpush.xpose.msk.msra.mxu3 %vm217_vm0, %v189_v11 }
  0x44   : > { %844 = vmatpush.xpose.msk.msra.mxu0 %vm217_vm0, %v188_v12  ;;  %907 = vmatpush.xpose.msk.msra.mxu1 %vm217_vm0, %v188_v12 }
  0x45   : > { %908 = vmatpush.xpose.msk.msra.mxu2 %vm217_vm0, %v188_v12  ;;  %909 = vmatpush.xpose.msk.msra.mxu3 %vm217_vm0, %v188_v12 }
  0x48   : > { %845 = vmatpush.xpose.msk.msra.mxu0 %vm217_vm0, %v187_v13  ;;  %910 = vmatpush.xpose.msk.msra.mxu1 %vm217_vm0, %v187_v13 }
  0x49   : > { %911 = vmatpush.xpose.msk.msra.mxu2 %vm217_vm0, %v187_v13  ;;  %912 = vmatpush.xpose.msk.msra.mxu3 %vm217_vm0, %v187_v13 }
  0x4c   : > { %846 = vmatpush.xpose.msk.msra.mxu0 %vm217_vm0, %v186_v14  ;;  %913 = vmatpush.xpose.msk.msra.mxu1 %vm217_vm0, %v186_v14 }
  0x4d   : > { %914 = vmatpush.xpose.msk.msra.mxu2 %vm217_vm0, %v186_v14  ;;  %915 = vmatpush.xpose.msk.msra.mxu3 %vm217_vm0, %v186_v14  ;;  %v214_v14 = vld [vmem:[%s1679_s2 + $0x68] sm:$0xff] }
  0x50   : > { %847 = vmatpush.xpose.msk.msra.mxu0 %vm217_vm0, %v185_v15  ;;  %916 = vmatpush.xpose.msk.msra.mxu1 %vm217_vm0, %v185_v15 }
  0x51   : > { %917 = vmatpush.xpose.msk.msra.mxu2 %vm217_vm0, %v185_v15  ;;  %918 = vmatpush.xpose.msk.msra.mxu3 %vm217_vm0, %v185_v15 }
  0x53   : > { %848 = vmatmul.msk.f32.vlgmr.msra.gmra.mxu0 %vm217_vm0, %v169_v16  ;;  %852 = vmatmul.msk.f32.vlgmr.msra.gmra.mxu1 %vm217_vm0, %v173_v17 }
  0x54   : > { %856 = vmatmul.msk.f32.vlgmr.msra.gmra.mxu2 %vm217_vm0, %v177_v18  ;;  %860 = vmatmul.msk.f32.vlgmr.msra.gmra.mxu3 %vm217_vm0, %v181_v19 }
  0x5b   : > { %849 = vmatmul.msk.f32.gmra.mxu0 %vm217_vm0, %v170_v20  ;;  %853 = vmatmul.msk.f32.gmra.mxu1 %vm217_vm0, %v174_v21 }
  0x5c   : > { %857 = vmatmul.msk.f32.gmra.mxu2 %vm217_vm0, %v178_v22  ;;  %861 = vmatmul.msk.f32.gmra.mxu3 %vm217_vm0, %v182_v23 }
  0x63   : > { %850 = vmatmul.msk.f32.gmra.mxu0 %vm217_vm0, %v171_v24  ;;  %854 = vmatmul.msk.f32.gmra.mxu1 %vm217_vm0, %v175_v25 }
  0x64   : > { %858 = vmatmul.msk.f32.gmra.mxu2 %vm217_vm0, %v179_v26  ;;  %862 = vmatmul.msk.f32.gmra.mxu3 %vm217_vm0, %v183_v27 }
  0x6b   : > { %851 = vmatmul.msk.f32.gmra.mxu0 %vm217_vm0, %v172_v28  ;;  %855 = vmatmul.msk.f32.gmra.mxu1 %vm217_vm0, %v176_v29 }
  0x6c   : > { %859 = vmatmul.msk.f32.gmra.mxu2 %vm217_vm0, %v180_v30  ;;  %863 = vmatmul.msk.f32.gmra.mxu3 %vm217_vm0, %v184_v31 }
  0xd0   : > { %v331_v34 = vpop.f32.mrf.mxu0  ;;  %v343_v35 = vpop.f32.mrf.mxu1 }
  0xd1   : > { %v1315_v36 = vadd.f32 %v331_v34, %v201_v32  ;;  %v1317_v37 = vadd.f32 %v343_v35, %v205_v33 }
  0xd3   : > { %387 = vmax.xlane.f32.xlu2 %v1317_v37  ;;  %379 = vmax.xlane.f32.xlu0 %v1315_v36 }
  0xd7   : > { %v355_v40 = vpop.f32.mrf.mxu2  ;;  %v367_v41 = vpop.f32.mrf.mxu3 }
  0xd8   : > { %v1327_v42 = vadd.f32 %v355_v40, %v209_v38  ;;  %v334_v43 = vpop.f32.mrf.mxu0  ;;  %v1329_v44 = vadd.f32 %v367_v41, %v213_v39  ;;  %v346_v46 = vpop.f32.mrf.mxu1 }
  0xd9   : > { %v1342_v50 = vadd.f32 %v346_v46, %v206_v45  ;;  %v1346_v54 = vadd.f32 %v334_v43, %v202_v48 }
  0xdb   : > { %395 = vmax.xlane.f32.xlu2 %v1327_v42  ;;  %403 = vmax.xlane.f32.xlu0 %v1329_v44 }
  0xdf   : > { %v358_v49 = vpop.f32.mrf.mxu2  ;;  %v370_v53 = vpop.f32.mrf.mxu3 }
  0xe0   : > { %v337_v51 = vpop.f32.mrf.mxu0  ;;  %v1359_v59 = vadd.f32 %v358_v49, %v210_v56  ;;  %v349_v60 = vpop.f32.mrf.mxu1  ;;  %v1402_v15 = vadd.f32 %v370_v53, %v214_v14 }
  0xe1   : > { %v1344_v52 = vadd.f32 %v337_v51, %v203_v47  ;;  %v1376_v5 = vadd.f32 %v349_v60, %v207_v1 }
  0xe3   : > { %389 = vmax.xlane.f32.xlu2 %v1342_v50  ;;  %383 = vmax.xlane.f32.xlu1 %v1344_v52 }
  0xe4   : > { %381 = vmax.xlane.f32.xlu0 %v1346_v54 }
  0xe7   : > { %v361_v57 = vpop.f32.mrf.mxu2  ;;  %v373_v61 = vpop.f32.mrf.mxu3 }
  0xe8   : > { %v1357_v58 = vadd.f32 %v361_v57, %v211_v55  ;;  %v340_v63 = vpop.f32.mrf.mxu0  ;;  %v352_v8 = vpop.f32.mrf.mxu1  ;;  %v1390_v11 = vadd.f32 %v373_v61, %v215_v6 }
  0xe9   : > { %v1372_v3 = vadd.f32 %v340_v63, %v204_v62  ;;  %v1392_v12 = vadd.f32 %v352_v8, %v208_v7 }
  0xeb   : > { %399 = vmax.xlane.f32.xlu1 %v1357_v58 }
  0xec   : > { %397 = vmax.xlane.f32.xlu0 %v1359_v59 }
  0xef   : > { %v364_v2 = vpop.f32.mrf.mxu2  ;;  %v376_v10 = vpop.f32.mrf.mxu3 }
  0xf0   : > { %v1374_v4 = vadd.f32 %v364_v2, %v212_v0  ;;  %v1394_v13 = vadd.f32 %v376_v10, %v216_v9 }
  0xf2   : > { %401 = vmax.xlane.f32.xlu2 %v1374_v4 }
  0xf3   : > { %385 = vmax.xlane.f32.xlu1 %v1372_v3 }
  0xf4   : > { %391 = vmax.xlane.f32.xlu0 %v1376_v5 }
  0xfa   : > { %407 = vmax.xlane.f32.xlu2 %v1390_v11 }
  0xfb   : > { %393 = vmax.xlane.f32.xlu1 %v1392_v12 }
  0xfc   : > { %409 = vmax.xlane.f32.xlu0 %v1394_v13 }
 0x103   : > { %405 = vmax.xlane.f32.xlu1 %v1402_v15 }
 0x146   : > { %v388_v16 = vpop.xlane.xlu2 %387  ;;  %v380_v17 = vpop.xlane.xlu0 %379 }
 0x147   : > { %v415_v18 = vsub.f32 %v1317_v37, %v388_v16  ;;  %v411_v19 = vsub.f32 %v1315_v36, %v380_v17 }
 0x149   : > { %v435_v20 = vmul.f32 1.442695, %v415_v18  ;;  %v427_v21 = vmul.f32 1.442695, %v411_v19 }
 0x14b   : > { %960 = vpow2.f32 %v435_v20 }
 0x14c   : > { %962 = vpow2.f32 %v427_v21 }
 0x14e   : > { %v396_v22 = vpop.xlane.xlu2 %395  ;;  %v404_v23 = vpop.xlane.xlu0 %403 }
 0x14f   : > { %v419_v24 = vsub.f32 %v1327_v42, %v396_v22  ;;  %v423_v25 = vsub.f32 %v1329_v44, %v404_v23 }
 0x151   : > { %v1409_v26 = vpop.eup %960  ;;  %v443_v27 = vmul.f32 1.442695, %v419_v24  ;;  %v451_v28 = vmul.f32 1.442695, %v423_v25 }
 0x152   : > { %v1411_v29 = vpop.eup %962  ;;  %467 = vadd.xlane.f32.xlu2 %v1409_v26 }
 0x153   : > { %964 = vpow2.f32 %v443_v27  ;;  %459 = vadd.xlane.f32.xlu1 %v1411_v29 }
 0x154   : > { %966 = vpow2.f32 %v451_v28 }
 0x156   : > { %v390_v30 = vpop.xlane.xlu2 %389  ;;  %v384_v31 = vpop.xlane.xlu1 %383 }
 0x157   : > { %v416_v32 = vsub.f32 %v1342_v50, %v390_v30  ;;  %v382_v33 = vpop.xlane.xlu0 %381  ;;  %v413_v38 = vsub.f32 %v1344_v52, %v384_v31 }
 0x158   : > { %v412_v34 = vsub.f32 %v1346_v54, %v382_v33 }
 0x159   : > { %v1417_v35 = vpop.eup %964  ;;  %v437_v36 = vmul.f32 1.442695, %v416_v32  ;;  %v431_v40 = vmul.f32 1.442695, %v413_v38 }
 0x15a   : > { %v1419_v37 = vpop.eup %966  ;;  %v429_v39 = vmul.f32 1.442695, %v412_v34  ;;  %475 = vadd.xlane.f32.xlu0 %v1417_v35 }
 0x15b   : > { %968 = vpow2.f32 %v437_v36  ;;  %483 = vadd.xlane.f32.xlu1 %v1419_v37 }
 0x15c   : > { %970 = vpow2.f32 %v429_v39 }
 0x15d   : > { %972 = vpow2.f32 %v431_v40 }
 0x15e   : > { %v400_v41 = vpop.xlane.xlu1 %399 }
 0x15f   : > { %v421_v42 = vsub.f32 %v1357_v58, %v400_v41  ;;  %v398_v43 = vpop.xlane.xlu0 %397 }
 0x160   : > { %v420_v44 = vsub.f32 %v1359_v59, %v398_v43 }
 0x161   : > { %v1426_v45 = vpop.eup %968  ;;  %v447_v46 = vmul.f32 1.442695, %v421_v42 }
 0x162   : > { %v445_v47 = vmul.f32 1.442695, %v420_v44  ;;  %469 = vadd.xlane.f32.xlu0 %v1426_v45  ;;  %v1429_v48 = vpop.eup %970 }
 0x163   : > { %974 = vpow2.f32 %v447_v46  ;;  %461 = vadd.xlane.f32.xlu2 %v1429_v48  ;;  %v1433_v53 = vpop.eup %972 }
 0x164   : > { %976 = vpow2.f32 %v445_v47 }
 0x165   : > { %v402_v49 = vpop.xlane.xlu2 %401 }
 0x166   : > { %v422_v50 = vsub.f32 %v1374_v4, %v402_v49  ;;  %v386_v51 = vpop.xlane.xlu1 %385 }
 0x167   : > { %v392_v52 = vpop.xlane.xlu0 %391  ;;  %v414_v59 = vsub.f32 %v1372_v3, %v386_v51 }
 0x168   : > { %v449_v54 = vmul.f32 1.442695, %v422_v50  ;;  %v417_v55 = vsub.f32 %v1376_v5, %v392_v52 }
 0x169   : > { %v1436_v56 = vpop.eup %974  ;;  %v433_v0 = vmul.f32 1.442695, %v414_v59 }
 0x16a   : > { %v1438_v57 = vpop.eup %976  ;;  %v439_v58 = vmul.f32 1.442695, %v417_v55  ;;  %463 = vadd.xlane.f32.xlu0 %v1433_v53  ;;  %978 = vpow2.f32 %v449_v54 }
 0x16b   : > { %477 = vadd.xlane.f32.xlu1 %v1438_v57  ;;  %479 = vadd.xlane.f32.xlu2 %v1436_v56 }
 0x16c   : > { %980 = vpow2.f32 %v439_v58 }
 0x16d   : > { %v408_v60 = vpop.xlane.xlu2 %407 }
 0x16e   : > { %v425_v61 = vsub.f32 %v1390_v11, %v408_v60  ;;  %v394_v62 = vpop.xlane.xlu1 %393 }
 0x16f   : > { %v418_v63 = vsub.f32 %v1392_v12, %v394_v62  ;;  %v410_v5 = vpop.xlane.xlu0 %409 }
 0x170   : > { %v455_v1 = vmul.f32 1.442695, %v425_v61  ;;  %v1446_v2 = vpop.eup %978  ;;  %v426_v3 = vsub.f32 %v1394_v13, %v410_v5 }
 0x171   : > { %v441_v4 = vmul.f32 1.442695, %v418_v63 }
 0x172   : > { %v1448_v6 = vpop.eup %980  ;;  %982 = vpow2.f32 %v455_v1  ;;  %481 = vadd.xlane.f32.xlu0 %v1446_v2  ;;  %v457_v10 = vmul.f32 1.442695, %v426_v3 }
 0x173   : > { %984 = vpow2.f32 %v441_v4  ;;  %471 = vadd.xlane.f32.xlu1 %v1448_v6 }
 0x174   : > { %986 = vpow2.f32 %v433_v0 }
 0x176   : > { %v406_v7 = vpop.xlane.xlu1 %405 }
 0x177   : > { %v424_v8 = vsub.f32 %v1402_v15, %v406_v7 }
 0x178   : > { %v1454_v9 = vpop.eup %982 }
 0x179   : > { %v1456_v11 = vpop.eup %984  ;;  %v453_v12 = vmul.f32 1.442695, %v424_v8 }
 0x17a   : > { %v1458_v14 = vpop.eup %986  ;;  %487 = vadd.xlane.f32.xlu0 %v1454_v9  ;;  %473 = vadd.xlane.f32.xlu2 %v1456_v11 }
 0x17b   : > { %988 = vpow2.f32 %v453_v12  ;;  %465 = vadd.xlane.f32.xlu1 %v1458_v14 }
 0x17c   : > { %990 = vpow2.f32 %v457_v10 }
 0x181   : > { %v1463_v13 = vpop.eup %988 }
 0x182   : > { %v1465_v16 = vpop.eup %990  ;;  %485 = vadd.xlane.f32.xlu2 %v1463_v13 }
 0x183   : > { %489 = vadd.xlane.f32.xlu1 %v1465_v16 }
 0x1c5   : > { %v468_v15 = vpop.xlane.xlu2 %467 }
 0x1c6   : > { %992 = vrcp.f32 %v468_v15  ;;  %v460_v17 = vpop.xlane.xlu1 %459  ;;  %v558_v25 = vand.u32 2147483648, %v468_v15  ;;  %v556_v30 = vand.u32 2147483647, %v468_v15  ;;  %vm552_vm3 = vweird.f32 %v468_v15 }
 0x1c7   : > { %994 = vrcp.f32 %v460_v17  ;;  %v502_v31 = vand.u32 2147483648, %v460_v17  ;;  %v500_v33 = vand.u32 2147483647, %v460_v17  ;;  %vm496_vm5 = vweird.f32 %v460_v17 }
 0x1c8   : > { %v559_v38 = vor.u32 1.1754944e-38, %v558_v25  ;;  %vm557_vm6 = vcmp.eq.f32.partialorder %v556_v30, 8.507059e+37 }
 0x1c9   : > { %v503_v42 = vor.u32 1.1754944e-38, %v502_v31  ;;  %vm501_vm8 = vcmp.eq.f32.partialorder %v500_v33, 8.507059e+37 }
 0x1cc   : > { %v993_v18 = vpop.eup %992 }
 0x1cd   : > { %v995_v19 = vpop.eup %994  ;;  %v548_v20 = vmul.f32 %v993_v18, %v468_v15  ;;  %v1469_v21 = vpop.xlane.xlu0 %475  ;;  %vm553_vm1 = vweird.f32 %v993_v18 }
 0x1ce   : > { %v492_v22 = vmul.f32 %v995_v19, %v460_v17  ;;  %v1471_v23 = vpop.xlane.xlu1 %483  ;;  %996 = vrcp.f32 %v1469_v21  ;;  %vm497_vm2 = vweird.f32 %v995_v19  ;;  %vm554_vm4 = vmor %vm552_vm3, %vm553_vm1  ;;  %v614_v59 = vand.u32 2147483648, %v1469_v21 }
 0x1cf   : > { %v549_v24 = vsub.f32 1.0, %v548_v20  ;;  %998 = vrcp.f32 %v1471_v23  ;;  %vm498_vm7 = vmor %vm496_vm5, %vm497_vm2  ;;  %v612_v61 = vand.u32 2147483647, %v1469_v21  ;;  %vm608_vm11 = vweird.f32 %v1469_v21 }
 0x1d0   : > { %v493_v27 = vsub.f32 1.0, %v492_v22  ;;  %vm664_vm12 = vweird.f32 %v1471_v23  ;;  %v615_v1 = vor.u32 1.1754944e-38, %v614_v59 }
 0x1d1   : > { %v550_v28 = vmul.f32 %v993_v18, %v549_v24  ;;  %vm613_vm15 = vcmp.eq.f32.partialorder %v612_v61, 8.507059e+37 }
 0x1d2   : > { %v494_v32 = vmul.f32 %v995_v19, %v493_v27 }
 0x1d3   : > { %v551_v34 = vadd.f32 %v993_v18, %v550_v28 }
 0x1d4   : > { %v997_v36 = vpop.eup %996  ;;  %v495_v39 = vadd.f32 %v995_v19, %v494_v32 }
 0x1d5   : > { %v999_v40 = vpop.eup %998  ;;  %v555_v41 = vsel %vm554_vm4, %v993_v18, %v551_v34  ;;  %v604_v43 = vmul.f32 %v997_v36, %v1469_v21  ;;  %v1479_v44 = vpop.xlane.xlu0 %469  ;;  %vm609_vm9 = vweird.f32 %v997_v36 }
 0x1d6   : > { %v560_v46 = vsel %vm557_vm6, %v559_v38, %v555_v41  ;;  %v499_v47 = vsel %vm498_vm7, %v995_v19, %v495_v39  ;;  %v660_v49 = vmul.f32 %v999_v40, %v1471_v23  ;;  %v1483_v54 = vpop.xlane.xlu2 %461  ;;  %1000 = vrcp.f32 %v1479_v44  ;;  %vm610_vm13 = vmor %vm608_vm11, %vm609_vm9 }
 0x1d7   : > { %v719_v50 = vmul.f32 %v1409_v26, %v560_v46  ;;  %v504_v51 = vsel %vm501_vm8, %v503_v42, %v499_v47  ;;  %v605_v52 = vsub.f32 1.0, %v604_v43  ;;  %1002 = vrcp.f32 %v1483_v54 }
 0x1d8   : > { %v715_v55 = vmul.f32 %v1411_v29, %v504_v51  ;;  %v661_v58 = vsub.f32 1.0, %v660_v49  ;;  %v670_v26 = vand.u32 2147483648, %v1471_v23  ;;  %vm665_vm10 = vweird.f32 %v999_v40 }
 0x1d9   : > { %735 = vst [vmem:[%s1489_s20 + $0x20] sm:$0xff] %v719_v50  ;;  %v606_v60 = vmul.f32 %v997_v36, %v605_v52  ;;  %v668_v29 = vand.u32 2147483647, %v1471_v23  ;;  %vm666_vm14 = vmor %vm664_vm12, %vm665_vm10  ;;  %v514_v21 = vand.u32 2147483647, %v1483_v54  ;;  %v516_v24 = vand.u32 2147483648, %v1483_v54 }
 0x1da   : > { %731 = vst [vmem:[%s1489_s20] sm:$0xff] %v715_v55  ;;  %v662_v62 = vmul.f32 %v999_v40, %v661_v58  ;;  %v671_v5 = vor.u32 1.1754944e-38, %v670_v26  ;;  %v570_v28 = vand.u32 2147483647, %v1479_v44  ;;  %v572_v30 = vand.u32 2147483648, %v1479_v44 }
 0x1db   : > { %v607_v63 = vadd.f32 %v997_v36, %v606_v60  ;;  %vm669_vm0 = vcmp.eq.f32.partialorder %v668_v29, 8.507059e+37  ;;  %vm510_vm2 = vweird.f32 %v1483_v54  ;;  %vm1518_vm4 = vcmp.eq.f32.partialorder %v514_v21, 8.507059e+37 }
 0x1dc   : > { %v663_v0 = vadd.f32 %v999_v40, %v662_v62  ;;  %v1001_v4 = vpop.eup %1000  ;;  %v517_v32 = vor.u32 1.1754944e-38, %v516_v24  ;;  %vm566_vm5 = vweird.f32 %v1479_v44  ;;  %vm571_vm7 = vcmp.eq.f32.partialorder %v570_v28, 8.507059e+37 }
 0x1dd   : > { %v611_v3 = vsel %vm610_vm13, %v997_v36, %v607_v63  ;;  %v1498_v7 = vpop.xlane.xlu0 %463  ;;  %v1003_v8 = vpop.eup %1002  ;;  %v562_v15 = vmul.f32 %v1001_v4, %v1479_v44  ;;  %vm567_vm1 = vweird.f32 %v1001_v4  ;;  %v573_v36 = vor.u32 1.1754944e-38, %v572_v30 }
 0x1de   : > { %v667_v10 = vsel %vm666_vm14, %v999_v40, %v663_v0  ;;  %v616_v12 = vsel %vm613_vm15, %v615_v1, %v611_v3  ;;  %v1501_v17 = vpop.xlane.xlu1 %477  ;;  %v506_v20 = vmul.f32 %v1003_v8, %v1483_v54  ;;  %v1506_v22 = vpop.xlane.xlu2 %479  ;;  %vm511_vm3 = vweird.f32 %v1003_v8  ;;  %vm568_vm6 = vmor %vm566_vm5, %vm567_vm1 }
 0x1df   : > { %v672_v18 = vsel %vm669_vm0, %v671_v5, %v667_v10  ;;  %v723_v19 = vmul.f32 %v1417_v35, %v616_v12  ;;  %v563_v25 = vsub.f32 1.0, %v562_v15  ;;  %1004 = vrcp.f32 %v1506_v22  ;;  %vm512_vm8 = vmor %vm510_vm2, %vm511_vm3 }
 0x1e0   : > { %v727_v23 = vmul.f32 %v1419_v37, %v672_v18  ;;  %v507_v27 = vsub.f32 1.0, %v506_v20  ;;  %1006 = vrcp.f32 %v1501_v17  ;;  %v640_v38 = vand.u32 2147483647, %v1506_v22 }
 0x1e1   : > { %739 = vst [vmem:[%s1489_s20 + $0x40] sm:$0xff] %v723_v19  ;;  %v564_v35 = vmul.f32 %v1001_v4, %v563_v25  ;;  %1008 = vrcp.f32 %v1498_v7  ;;  %vm636_vm9 = vweird.f32 %v1506_v22  ;;  %v642_v42 = vand.u32 2147483648, %v1506_v22 }
 0x1e2   : > { %743 = vst [vmem:[%s1489_s20 + $0x60] sm:$0xff] %v727_v23  ;;  %v508_v31 = vmul.f32 %v1003_v8, %v507_v27  ;;  %v626_v50 = vand.u32 2147483647, %v1501_v17  ;;  %vm622_vm10 = vweird.f32 %v1501_v17  ;;  %vm1539_vm11 = vcmp.eq.f32.partialorder %v640_v38, 8.507059e+37 }
 0x1e3   : > { %v565_v33 = vadd.f32 %v1001_v4, %v564_v35  ;;  %v628_v60 = vand.u32 2147483648, %v1501_v17  ;;  %v643_v61 = vor.u32 1.1754944e-38, %v642_v42  ;;  %v530_v5 = vand.u32 2147483648, %v1498_v7 }
 0x1e4   : > { %v509_v34 = vadd.f32 %v1003_v8, %v508_v31  ;;  %vm1548_vm13 = vcmp.eq.f32.partialorder %v626_v50, 8.507059e+37  ;;  %vm524_vm15 = vweird.f32 %v1498_v7 }
 0x1e5   : > { %v1524_v39 = vpop.xlane.xlu0 %481  ;;  %v1005_v40 = vpop.eup %1004  ;;  %v569_v41 = vsel %vm568_vm6, %v1001_v4, %v565_v33  ;;  %v531_v28 = vor.u32 1.1754944e-38, %v530_v5 }
 0x1e6   : > { %v1528_v43 = vpop.xlane.xlu1 %471  ;;  %1010 = vrcp.f32 %v1524_v39  ;;  %v1007_v44 = vpop.eup %1006  ;;  %v513_v46 = vsel %vm512_vm8, %v1003_v8, %v509_v34  ;;  %v574_v47 = vsel %vm571_vm7, %v573_v36, %v569_v41  ;;  %v632_v49 = vmul.f32 %v1005_v40, %v1506_v22 }
 0x1e7   : > { %v518_v51 = vsel %vm1518_vm4, %v517_v32, %v513_v46  ;;  %v720_v52 = vmul.f32 %v1426_v45, %v574_v47  ;;  %v618_v54 = vmul.f32 %v1007_v44, %v1501_v17  ;;  %v1009_v55 = vpop.eup %1008  ;;  %1012 = vrcp.f32 %v1528_v43 }
 0x1e8   : > { %v716_v58 = vmul.f32 %v1429_v48, %v518_v51  ;;  %v633_v59 = vsub.f32 1.0, %v632_v49  ;;  %v520_v29 = vmul.f32 %v1009_v55, %v1498_v7  ;;  %vm637_vm12 = vweird.f32 %v1005_v40 }
 0x1e9   : > { %736 = vst [vmem:[%s1489_s20 + $0x28] sm:$0xff] %v720_v52  ;;  %v619_v62 = vsub.f32 1.0, %v618_v54  ;;  %v528_v48 = vand.u32 2147483647, %v1498_v7  ;;  %vm623_vm14 = vweird.f32 %v1007_v44  ;;  %v629_v8 = vor.u32 1.1754944e-38, %v628_v60  ;;  %vm638_vm0 = vmor %vm636_vm9, %vm637_vm12 }
 0x1ea   : > { %732 = vst [vmem:[%s1489_s20 + $0x8] sm:$0xff] %v716_v58  ;;  %v634_v45 = vmul.f32 %v1005_v40, %v633_v59  ;;  %v521_v4 = vsub.f32 1.0, %v520_v29  ;;  %vm525_vm1 = vweird.f32 %v1009_v55  ;;  %v654_v19 = vand.u32 2147483647, %v1524_v39  ;;  %vm624_vm2 = vmor %vm622_vm10, %vm623_vm14 }
 0x1eb   : > { %v620_v1 = vmul.f32 %v1007_v44, %v619_v62  ;;  %vm1563_vm3 = vcmp.eq.f32.partialorder %v528_v48, 8.507059e+37  ;;  %vm526_vm4 = vmor %vm524_vm15, %vm525_vm1  ;;  %v656_v37 = vand.u32 2147483648, %v1524_v39  ;;  %vm650_vm6 = vweird.f32 %v1524_v39 }
 0x1ec   : > { %v1011_v0 = vpop.eup %1010  ;;  %v635_v3 = vadd.f32 %v1005_v40, %v634_v45  ;;  %v522_v18 = vmul.f32 %v1009_v55, %v521_v4  ;;  %vm655_vm9 = vcmp.eq.f32.partialorder %v654_v19, 8.507059e+37  ;;  %vm580_vm10 = vweird.f32 %v1528_v43 }
 0x1ed   : > { %v646_v10 = vmul.f32 %v1011_v0, %v1524_v39  ;;  %v1556_v12 = vpop.xlane.xlu2 %473  ;;  %v621_v15 = vadd.f32 %v1007_v44, %v620_v1  ;;  %v1013_v24 = vpop.eup %1012  ;;  %vm651_vm5 = vweird.f32 %v1011_v0  ;;  %v657_v46 = vor.u32 1.1754944e-38, %v656_v37 }
 0x1ee   : > { %v639_v20 = vsel %vm638_vm0, %v1005_v40, %v635_v3  ;;  %1014 = vrcp.f32 %v1556_v12  ;;  %v523_v27 = vadd.f32 %v1009_v55, %v522_v18  ;;  %v1570_v30 = vpop.xlane.xlu1 %465  ;;  %v576_v31 = vmul.f32 %v1013_v24, %v1528_v43  ;;  %v1581_v36 = vpop.xlane.xlu0 %487  ;;  %vm652_vm8 = vmor %vm650_vm6, %vm651_vm5 }
 0x1ef   : > { %v647_v23 = vsub.f32 1.0, %v646_v10  ;;  %v644_v22 = vsel %vm1539_vm11, %v643_v61, %v639_v20  ;;  %v625_v25 = vsel %vm624_vm2, %v1007_v44, %v621_v15  ;;  %1016 = vrcp.f32 %v1570_v30 }
 0x1f0   : > { %v725_v17 = vmul.f32 %v1436_v56, %v644_v22  ;;  %v630_v35 = vsel %vm1548_vm13, %v629_v8, %v625_v25  ;;  %v527_v33 = vsel %vm526_vm4, %v1009_v55, %v523_v27  ;;  %v577_v38 = vsub.f32 1.0, %v576_v31 }
 0x1f1   : > { %v724_v32 = vmul.f32 %v1438_v57, %v630_v35  ;;  %v648_v34 = vmul.f32 %v1011_v0, %v647_v23  ;;  %v532_v56 = vsel %vm1563_vm3, %v531_v28, %v527_v33  ;;  %v584_v57 = vand.u32 2147483647, %v1528_v43 }
 0x1f2   : > { %741 = vst [vmem:[%s1489_s20 + $0x50] sm:$0xff] %v725_v17  ;;  %v717_v7 = vmul.f32 %v1433_v53, %v532_v56  ;;  %v586_v40 = vand.u32 2147483648, %v1528_v43  ;;  %v578_v44 = vmul.f32 %v1013_v24, %v577_v38  ;;  %vm581_vm7 = vweird.f32 %v1013_v24 }
 0x1f3   : > { %740 = vst [vmem:[%s1489_s20 + $0x48] sm:$0xff] %v724_v32  ;;  %v649_v41 = vadd.f32 %v1011_v0, %v648_v34  ;;  %1018 = vrcp.f32 %v1581_v36  ;;  %v598_v51 = vand.u32 2147483647, %v1556_v12  ;;  %vm582_vm11 = vmor %vm580_vm10, %vm581_vm7  ;;  %vm585_vm12 = vcmp.eq.f32.partialorder %v584_v57, 8.507059e+37 }
 0x1f4   : > { %v1015_v42 = vpop.eup %1014  ;;  %733 = vst [vmem:[%s1489_s20 + $0x10] sm:$0xff] %v717_v7  ;;  %v579_v49 = vadd.f32 %v1013_v24, %v578_v44  ;;  %v587_v52 = vor.u32 1.1754944e-38, %v586_v40  ;;  %v600_v26 = vand.u32 2147483648, %v1556_v12  ;;  %vm594_vm14 = vweird.f32 %v1556_v12 }
 0x1f5   : > { %v653_v39 = vsel %vm652_vm8, %v1011_v0, %v649_v41  ;;  %v590_v47 = vmul.f32 %v1015_v42, %v1556_v12  ;;  %v1596_v53 = vpop.xlane.xlu2 %485  ;;  %v1017_v58 = vpop.eup %1016  ;;  %vm595_vm13 = vweird.f32 %v1015_v42  ;;  %vm1609_vm15 = vcmp.eq.f32.partialorder %v598_v51, 8.507059e+37 }
 0x1f6   : > { %v658_v50 = vsel %vm655_vm9, %v657_v46, %v653_v39  ;;  %v583_v59 = vsel %vm582_vm11, %v1013_v24, %v579_v49  ;;  %1020 = vrcp.f32 %v1596_v53  ;;  %v534_v43 = vmul.f32 %v1017_v58, %v1570_v30  ;;  %v1605_v62 = vpop.xlane.xlu1 %489  ;;  %vm596_vm0 = vmor %vm594_vm14, %vm595_vm13 }
 0x1f7   : > { %v726_v54 = vmul.f32 %v1446_v2, %v658_v50  ;;  %v591_v55 = vsub.f32 1.0, %v590_v47  ;;  %v588_v60 = vsel %vm585_vm12, %v587_v52, %v583_v59  ;;  %v542_v0 = vand.u32 2147483647, %v1570_v30 }
 0x1f8   : > { %v721_v2 = vmul.f32 %v1448_v6, %v588_v60  ;;  %v535_v48 = vsub.f32 1.0, %v534_v43  ;;  %v601_v4 = vor.u32 1.1754944e-38, %v600_v26  ;;  %v544_v5 = vand.u32 2147483648, %v1570_v30 }
 0x1f9   : > { %742 = vst [vmem:[%s1489_s20 + $0x58] sm:$0xff] %v726_v54  ;;  %v592_v61 = vmul.f32 %v1015_v42, %v591_v55  ;;  %v1019_v29 = vpop.eup %1018  ;;  %v696_v3 = vand.u32 2147483647, %v1581_v36  ;;  %1022 = vrcp.f32 %v1605_v62  ;;  %vm539_vm1 = vweird.f32 %v1017_v58 }
 0x1fa   : > { %v688_v1 = vmul.f32 %v1019_v29, %v1581_v36  ;;  %737 = vst [vmem:[%s1489_s20 + $0x30] sm:$0xff] %v721_v2  ;;  %v536_v8 = vmul.f32 %v1017_v58, %v535_v48  ;;  %vm538_vm2 = vweird.f32 %v1570_v30  ;;  %vm693_vm3 = vweird.f32 %v1019_v29 }
 0x1fb   : > { %v593_v63 = vadd.f32 %v1015_v42, %v592_v61  ;;  %v698_v18 = vand.u32 2147483648, %v1581_v36  ;;  %vm540_vm4 = vmor %vm538_vm2, %vm539_vm1  ;;  %vm543_vm5 = vcmp.eq.f32.partialorder %v542_v0, 8.507059e+37  ;;  %v545_v24 = vor.u32 1.1754944e-38, %v544_v5 }
 0x1fc   : > { %v689_v10 = vsub.f32 1.0, %v688_v1  ;;  %v1021_v12 = vpop.eup %1020  ;;  %v537_v20 = vadd.f32 %v1017_v58, %v536_v8  ;;  %vm692_vm6 = vweird.f32 %v1581_v36  ;;  %v682_v22 = vand.u32 2147483647, %v1596_v53 }
 0x1fd   : > { %v597_v6 = vsel %vm596_vm0, %v1015_v42, %v593_v63  ;;  %v674_v23 = vmul.f32 %v1021_v12, %v1596_v53  ;;  %vm697_vm7 = vcmp.eq.f32.partialorder %v696_v3, 8.507059e+37  ;;  %vm694_vm8 = vmor %vm692_vm6, %vm693_vm3  ;;  %v699_v17 = vor.u32 1.1754944e-38, %v698_v18 }
 0x1fe   : > { %v602_v15 = vsel %vm1609_vm15, %v601_v4, %v597_v6  ;;  %v690_v21 = vmul.f32 %v1019_v29, %v689_v10  ;;  %v541_v25 = vsel %vm540_vm4, %v1017_v58, %v537_v20  ;;  %vm679_vm9 = vweird.f32 %v1021_v12 }
 0x1ff   : > { %v722_v19 = vmul.f32 %v1456_v11, %v602_v15  ;;  %v675_v28 = vsub.f32 1.0, %v674_v23  ;;  %v1023_v30 = vpop.eup %1022  ;;  %v546_v11 = vsel %vm543_vm5, %v545_v24, %v541_v25  ;;  %v684_v35 = vand.u32 2147483648, %v1596_v53 }
 0x200   : > { %v691_v27 = vadd.f32 %v1019_v29, %v690_v21  ;;  %v718_v31 = vmul.f32 %v1458_v14, %v546_v11  ;;  %v702_v33 = vmul.f32 %v1023_v30, %v1605_v62  ;;  %vm678_vm10 = vweird.f32 %v1596_v53 }
 0x201   : > { %738 = vst [vmem:[%s1489_s20 + $0x38] sm:$0xff] %v722_v19  ;;  %v676_v32 = vmul.f32 %v1021_v12, %v675_v28  ;;  %vm680_vm11 = vmor %vm678_vm10, %vm679_vm9  ;;  %vm683_vm12 = vcmp.eq.f32.partialorder %v682_v22, 8.507059e+37  ;;  %v685_v7 = vor.u32 1.1754944e-38, %v684_v35  ;;  %v712_v14 = vand.u32 2147483648, %v1605_v62 }
 0x202   : > { %v695_v37 = vsel %vm694_vm8, %v1019_v29, %v691_v27  ;;  %734 = vst [vmem:[%s1489_s20 + $0x18] sm:$0xff] %v718_v31  ;;  %v703_v38 = vsub.f32 1.0, %v702_v33  ;;  %vm707_vm13 = vweird.f32 %v1023_v30  ;;  %v710_v41 = vand.u32 2147483647, %v1605_v62 }
 0x203   : > { %v700_v34 = vsel %vm697_vm7, %v699_v17, %v695_v37  ;;  %v677_v56 = vadd.f32 %v1021_v12, %v676_v32  ;;  %vm706_vm14 = vweird.f32 %v1605_v62  ;;  %v713_v46 = vor.u32 1.1754944e-38, %v712_v14 }
 0x204   : > { %v729_v36 = vmul.f32 %v1454_v9, %v700_v34  ;;  %v704_v40 = vmul.f32 %v1023_v30, %v703_v38  ;;  %vm708_vm15 = vmor %vm706_vm14, %vm707_vm13  ;;  %vm711_vm0 = vcmp.eq.f32.partialorder %v710_v41, 8.507059e+37 }
 0x205   : > { %v681_v57 = vsel %vm680_vm11, %v1021_v12, %v677_v56 }
 0x206   : > { %745 = vst [vmem:[%s1489_s20 + $0x70] sm:$0xff] %v729_v36  ;;  %v686_v9 = vsel %vm683_vm12, %v685_v7, %v681_v57  ;;  %v705_v44 = vadd.f32 %v1023_v30, %v704_v40 }
 0x207   : > { %v728_v42 = vmul.f32 %v1463_v13, %v686_v9 }
 0x208   : > { %v709_v39 = vsel %vm708_vm15, %v1023_v30, %v705_v44 }
 0x209   : > { %744 = vst [vmem:[%s1489_s20 + $0x68] sm:$0xff] %v728_v42  ;;  %v714_v47 = vsel %vm711_vm0, %v713_v46, %v709_v39 }
 0x20a   : > { %v730_v53 = vmul.f32 %v1465_v16, %v714_v47 }
 0x20c   : > { %746 = vst [vmem:[%s1489_s20 + $0x78] sm:$0xff] %v730_v53 }
 0x20d   : > { %1051 = shalt.err (!%p1048_p3)
}
 0x20e   : > { %s1088_s10 = smov 128   ;;  %s1089_s11 = smov 8  }
 0x20f   : > { %919 = dma.vmem_to_hbm [thread:$0]  (%p1148_p5), %s761_s27, 2048, %s763_s28, %s748_s29, %s1088_s10, %s1088_s10, %s1089_s11  }
 0x210 PF: > { %p925_p4 = scmp.ge.s32.totalorder %s1086_s15, 2  ;;  %s777_s17 = sand.u32 1, %s1074_s12  }
 0x211   : > { %s778_s19 = scalar_lea.sflag [#allocation3], %s777_s17 }
 0x212   : > { %p922_p7 = pnand %p925_p4, %p1152_p6 }
 0x214   : > { %p923_p8 = pneg %p922_p7 }
 0x216   : > { %1069 = dma.done.wait (%p923_p8), %s778_s19, 2048  }
 0x217   : > { %1071 = vsyncadd (%p923_p8), %s778_s19, 4294965248  ;;  %p13_p9 = scmp.ge.s32.totalorder %s1135_s18, 4   ;;  %s1693_s12 = smov %s1078_s13 }
 0x218   : > { %s1694_s13 = smov %s1082_s14  ;;  %s1695_s14 = smov %s1146_s21 }
 0x219   : > { %s1696_s15 = smov %s1135_s18  ;;  %15 = sbr.rel (!%p13_p9) target bundleno = 3 (0x3), region = 67 }
 0x21e   :  { %784 = vsyncpa [#allocation3], 1 }
 0x21f   :  { %786 = vsyncpa [#allocation3 + $0x1], 1 }

</bundles_post_ra>
